<compile_context>
chip_gen: v7x
topology: tpu7x:2x2x1
jax: 0.10.0
libtpu: 0.0.40
codegen_flags: <defaults>
</compile_context>

<pallas_src>
import jax
import jax.numpy as jnp
from jax.experimental import pallas as pl
from jax.experimental.pallas import tpu as pltpu


def _round_up(v, m):
    return (v + m - 1) // m * m


def _dot3(a, b):
    """3-pass bf16 hi/lo matmul of f32 operands with f32 accumulation (MXU)."""
    a_hi = a.astype(jnp.bfloat16)
    a_lo = (a - a_hi.astype(jnp.float32)).astype(jnp.bfloat16)
    b_hi = b.astype(jnp.bfloat16)
    b_lo = (b - b_hi.astype(jnp.float32)).astype(jnp.bfloat16)
    acc = jnp.dot(a_hi, b_hi, preferred_element_type=jnp.float32)
    acc = acc + jnp.dot(a_lo, b_hi, preferred_element_type=jnp.float32)
    acc = acc + jnp.dot(a_hi, b_lo, preferred_element_type=jnp.float32)
    return acc


def _mlp_kernel(x_ref, w1_ref, b1_ref, w2_ref, b2_ref, w3_ref, b3_ref, o_ref):
    # One batch tile per grid step; all weights/biases are VMEM-resident.
    x = x_ref[...]
    h1 = jnp.maximum(_dot3(x, w1_ref[...]) + b1_ref[...], 0.0)
    h2 = jnp.maximum(_dot3(h1, w2_ref[...]) + b2_ref[...], 0.0)
    out = _dot3(h2, w3_ref[...]) + b3_ref[...]
    o_ref[...] = out.astype(o_ref.dtype)


def net_forward(x, params, *, tm=1024):
    """Forward pass of Net.

    x: [batch, n_input] float32.
    params: dict with w1,b1,w2,b2,w3,b3 (float32); w_k stored [in_k, out_k]
            (transposed vs. PyTorch's [out, in]), b_k of shape [out_k] or
            [1, out_k].
    Returns [batch, n_output] float32.
    """
    x = x.astype(jnp.float32)
    w1 = params["w1"].astype(jnp.float32)
    w2 = params["w2"].astype(jnp.float32)
    w3 = params["w3"].astype(jnp.float32)
    b1 = params["b1"].reshape(1, -1).astype(jnp.float32)
    b2 = params["b2"].reshape(1, -1).astype(jnp.float32)
    b3 = params["b3"].reshape(1, -1).astype(jnp.float32)

    batch, n_input = x.shape
    h1_dim, h2_dim, n_output = w1.shape[1], w2.shape[1], w3.shape[1]

    # Batch tile: multiple of 8 sublanes (or the full batch when batch < 8).
    # Cap so the grid has >= 2 steps when possible -> both v7x cores get work.
    tm = max(8, (int(tm) // 8) * 8)
    if batch <= 8:
        tm_eff = batch                      # full-dim block, always legal
    else:
        half = _round_up(-(-batch // 2), 8)  # ceil(batch/2) rounded up to 8
        tm_eff = min(tm, max(8, half), _round_up(batch, 8))
    grid = (pl.cdiv(batch, tm_eff),)        # partial final tile handled by Pallas

    def resident(shape):
        return pl.BlockSpec(shape, lambda i: (0, 0))

    # Advisory cost estimate (3 MXU passes per layer).
    flops = 3 * 2 * batch * (n_input * h1_dim + h1_dim * h2_dim + h2_dim * n_output)
    bytes_accessed = 4 * (
        batch * n_input + batch * n_output
        + n_input * h1_dim + h1_dim * h2_dim + h2_dim * n_output
        + h1_dim + h2_dim + n_output
    )

    out = pl.pallas_call(
        _mlp_kernel,
        out_shape=jax.ShapeDtypeStruct((batch, n_output), jnp.float32),
        grid=grid,
        in_specs=[
            pl.BlockSpec((tm_eff, n_input), lambda i: (i, 0)),
            resident((n_input, h1_dim)),
            resident((1, h1_dim)),
            resident((h1_dim, h2_dim)),
            resident((1, h2_dim)),
            resident((h2_dim, n_output)),
            resident((1, n_output)),
        ],
        out_specs=pl.BlockSpec((tm_eff, n_output), lambda i: (i, 0)),
        compiler_params=pltpu.CompilerParams(
            dimension_semantics=("parallel",)),
        cost_estimate=pl.CostEstimate(
            flops=flops, transcendentals=0, bytes_accessed=bytes_accessed),
    )(x, w1, b1, w2, b2, w3, b3)

    return out


def init_params(key, n_input, n_output):
    """Deterministic init mimicking torch.nn.Linear default U(-1/sqrt(fan_in), +)."""
    dims = [(n_input, 50), (50, 200), (200, n_output)]
    params = {}
    keys = jax.random.split(key, 2 * len(dims))
    for i, (fan_in, fan_out) in enumerate(dims):
        bound = 1.0 / float(fan_in) ** 0.5
        params[f"w{i + 1}"] = jax.random.uniform(
            keys[2 * i], (fan_in, fan_out), jnp.float32, minval=-bound, maxval=bound)
        params[f"b{i + 1}"] = jax.random.uniform(
            keys[2 * i + 1], (1, fan_out), jnp.float32, minval=-bound, maxval=bound)
    return params


def reference_forward_f32(x, params):
    """Pure-JAX full-f32 reference (precision=HIGHEST so TPU doesn't demote)."""
    hp = jax.lax.Precision.HIGHEST
    h1 = jnp.maximum(
        jnp.dot(x, params["w1"], precision=hp) + params["b1"].reshape(1, -1), 0.0)
    h2 = jnp.maximum(
        jnp.dot(h1, params["w2"], precision=hp) + params["b2"].reshape(1, -1), 0.0)
    return jnp.dot(h2, params["w3"], precision=hp) + params["b3"].reshape(1, -1)


if __name__ == "__main__":
    key = jax.random.PRNGKey(0)
    k_param, k_x, k_x2 = jax.random.split(key, 3)

    batch, n_input, n_output = 8, 32, 16
    params = init_params(k_param, n_input, n_output)
    x = jax.random.normal(k_x, (batch, n_input), jnp.float32)

    out = jax.block_until_ready(net_forward(x, params))
    assert out.shape == (batch, n_output)
    ref = reference_forward_f32(x, params)
    err = jnp.max(jnp.abs(out - ref))
    assert jnp.allclose(out, ref, atol=2e-3, rtol=2e-3), f"mismatch: {err}"

    # Multi-step grid with a partial final tile (batch=40, tile=16 -> grid=3).
    batch2 = 40
    x2 = jax.random.normal(k_x2, (batch2, n_input), jnp.float32)
    out2 = jax.block_until_ready(net_forward(x2, params, tm=16))
    assert out2.shape == (batch2, n_output)
    ref2 = reference_forward_f32(x2, params)
    err2 = jnp.max(jnp.abs(out2 - ref2))
    assert jnp.allclose(out2, ref2, atol=2e-3, rtol=2e-3), f"gridded mismatch: {err2}"

    print("KERNEL_OK")
</pallas_src>

<mosaic_0001>
module attributes {stable_mosaic.version = 11 : i64} {
  func.func @_mlp_kernel(%arg0: i32, %arg1: memref<8x32xf32, #tpu.memory_space<vmem>>, %arg2: memref<32x50xf32, #tpu.memory_space<vmem>>, %arg3: memref<1x50xf32, #tpu.memory_space<vmem>>, %arg4: memref<50x200xf32, #tpu.memory_space<vmem>>, %arg5: memref<1x200xf32, #tpu.memory_space<vmem>>, %arg6: memref<200x16xf32, #tpu.memory_space<vmem>>, %arg7: memref<1x16xf32, #tpu.memory_space<vmem>>, %arg8: memref<8x16xf32, #tpu.memory_space<vmem>>) attributes {dimension_semantics = [#tpu.dimension_semantics<parallel>], iteration_bounds = array<i64: 1>, scalar_prefetch = 0 : i64, scratch_operands = 0 : i64, tpu.core_type = #tpu.core_type<tc>, window_params = [{transform_indices = @transform_0, window_bounds = array<i64: 8, 32>}, {pipeline_mode = #tpu.pipeline_mode<synchronous>, transform_indices = @transform_1, window_bounds = array<i64: 32, 50>}, {pipeline_mode = #tpu.pipeline_mode<synchronous>, transform_indices = @transform_2, window_bounds = array<i64: 1, 50>}, {pipeline_mode = #tpu.pipeline_mode<synchronous>, transform_indices = @transform_3, window_bounds = array<i64: 50, 200>}, {pipeline_mode = #tpu.pipeline_mode<synchronous>, transform_indices = @transform_4, window_bounds = array<i64: 1, 200>}, {pipeline_mode = #tpu.pipeline_mode<synchronous>, transform_indices = @transform_5, window_bounds = array<i64: 200, 16>}, {pipeline_mode = #tpu.pipeline_mode<synchronous>, transform_indices = @transform_6, window_bounds = array<i64: 1, 16>}, {transform_indices = @transform_7, window_bounds = array<i64: 8, 16>}]} {
    %c0 = arith.constant 0 : index
    %c0_0 = arith.constant 0 : index
    %0 = vector.load %arg1[%c0, %c0_0] : memref<8x32xf32, #tpu.memory_space<vmem>>, vector<8x32xf32>
    %c0_1 = arith.constant 0 : index
    %c0_2 = arith.constant 0 : index
    %1 = vector.load %arg2[%c0_1, %c0_2] : memref<32x50xf32, #tpu.memory_space<vmem>>, vector<32x50xf32>
    %2 = arith.truncf %0 : vector<8x32xf32> to vector<8x32xbf16>
    %3 = arith.extf %2 : vector<8x32xbf16> to vector<8x32xf32>
    %4 = arith.subf %0, %3 : vector<8x32xf32>
    %5 = arith.truncf %4 : vector<8x32xf32> to vector<8x32xbf16>
    %6 = arith.truncf %1 : vector<32x50xf32> to vector<32x50xbf16>
    %7 = arith.extf %6 : vector<32x50xbf16> to vector<32x50xf32>
    %8 = arith.subf %1, %7 : vector<32x50xf32>
    %9 = arith.truncf %8 : vector<32x50xf32> to vector<32x50xbf16>
    %cst = arith.constant dense<0.000000e+00> : vector<8x50xf32>
    %10 = tpu.matmul %2, %6, %cst {dimension_numbers = #tpu.dot_dimension_numbers<[1], [0], [0], [1], [0, 0, 1, 1], [], []>} : vector<8x32xbf16>, vector<32x50xbf16>, vector<8x50xf32> -> vector<8x50xf32>
    %cst_3 = arith.constant dense<0.000000e+00> : vector<8x50xf32>
    %11 = tpu.matmul %5, %6, %cst_3 {dimension_numbers = #tpu.dot_dimension_numbers<[1], [0], [0], [1], [0, 0, 1, 1], [], []>} : vector<8x32xbf16>, vector<32x50xbf16>, vector<8x50xf32> -> vector<8x50xf32>
    %12 = arith.addf %10, %11 : vector<8x50xf32>
    %cst_4 = arith.constant dense<0.000000e+00> : vector<8x50xf32>
    %13 = tpu.matmul %2, %9, %cst_4 {dimension_numbers = #tpu.dot_dimension_numbers<[1], [0], [0], [1], [0, 0, 1, 1], [], []>} : vector<8x32xbf16>, vector<32x50xbf16>, vector<8x50xf32> -> vector<8x50xf32>
    %14 = arith.addf %12, %13 : vector<8x50xf32>
    %c0_5 = arith.constant 0 : index
    %c0_6 = arith.constant 0 : index
    %15 = vector.load %arg3[%c0_5, %c0_6] : memref<1x50xf32, #tpu.memory_space<vmem>>, vector<1x50xf32>
    %16 = vector.broadcast %15 : vector<1x50xf32> to vector<8x50xf32>
    %17 = arith.addf %14, %16 : vector<8x50xf32>
    %cst_7 = arith.constant 0.000000e+00 : f32
    %18 = vector.broadcast %cst_7 : f32 to vector<8x50xf32>
    %19 = arith.maximumf %17, %18 : vector<8x50xf32>
    %c0_8 = arith.constant 0 : index
    %c0_9 = arith.constant 0 : index
    %20 = vector.load %arg4[%c0_8, %c0_9] : memref<50x200xf32, #tpu.memory_space<vmem>>, vector<50x200xf32>
    %21 = arith.truncf %19 : vector<8x50xf32> to vector<8x50xbf16>
    %22 = arith.extf %21 : vector<8x50xbf16> to vector<8x50xf32>
    %23 = arith.subf %19, %22 : vector<8x50xf32>
    %24 = arith.truncf %23 : vector<8x50xf32> to vector<8x50xbf16>
    %25 = arith.truncf %20 : vector<50x200xf32> to vector<50x200xbf16>
    %26 = arith.extf %25 : vector<50x200xbf16> to vector<50x200xf32>
    %27 = arith.subf %20, %26 : vector<50x200xf32>
    %28 = arith.truncf %27 : vector<50x200xf32> to vector<50x200xbf16>
    %cst_10 = arith.constant dense<0.000000e+00> : vector<8x200xf32>
    %29 = tpu.matmul %21, %25, %cst_10 {dimension_numbers = #tpu.dot_dimension_numbers<[1], [0], [0], [1], [0, 0, 1, 1], [], []>} : vector<8x50xbf16>, vector<50x200xbf16>, vector<8x200xf32> -> vector<8x200xf32>
    %cst_11 = arith.constant dense<0.000000e+00> : vector<8x200xf32>
    %30 = tpu.matmul %24, %25, %cst_11 {dimension_numbers = #tpu.dot_dimension_numbers<[1], [0], [0], [1], [0, 0, 1, 1], [], []>} : vector<8x50xbf16>, vector<50x200xbf16>, vector<8x200xf32> -> vector<8x200xf32>
    %31 = arith.addf %29, %30 : vector<8x200xf32>
    %cst_12 = arith.constant dense<0.000000e+00> : vector<8x200xf32>
    %32 = tpu.matmul %21, %28, %cst_12 {dimension_numbers = #tpu.dot_dimension_numbers<[1], [0], [0], [1], [0, 0, 1, 1], [], []>} : vector<8x50xbf16>, vector<50x200xbf16>, vector<8x200xf32> -> vector<8x200xf32>
    %33 = arith.addf %31, %32 : vector<8x200xf32>
    %c0_13 = arith.constant 0 : index
    %c0_14 = arith.constant 0 : index
    %34 = vector.load %arg5[%c0_13, %c0_14] : memref<1x200xf32, #tpu.memory_space<vmem>>, vector<1x200xf32>
    %35 = vector.broadcast %34 : vector<1x200xf32> to vector<8x200xf32>
    %36 = arith.addf %33, %35 : vector<8x200xf32>
    %cst_15 = arith.constant 0.000000e+00 : f32
    %37 = vector.broadcast %cst_15 : f32 to vector<8x200xf32>
    %38 = arith.maximumf %36, %37 : vector<8x200xf32>
    %c0_16 = arith.constant 0 : index
    %c0_17 = arith.constant 0 : index
    %39 = vector.load %arg6[%c0_16, %c0_17] : memref<200x16xf32, #tpu.memory_space<vmem>>, vector<200x16xf32>
    %40 = arith.truncf %38 : vector<8x200xf32> to vector<8x200xbf16>
    %41 = arith.extf %40 : vector<8x200xbf16> to vector<8x200xf32>
    %42 = arith.subf %38, %41 : vector<8x200xf32>
    %43 = arith.truncf %42 : vector<8x200xf32> to vector<8x200xbf16>
    %44 = arith.truncf %39 : vector<200x16xf32> to vector<200x16xbf16>
    %45 = arith.extf %44 : vector<200x16xbf16> to vector<200x16xf32>
    %46 = arith.subf %39, %45 : vector<200x16xf32>
    %47 = arith.truncf %46 : vector<200x16xf32> to vector<200x16xbf16>
    %cst_18 = arith.constant dense<0.000000e+00> : vector<8x16xf32>
    %48 = tpu.matmul %40, %44, %cst_18 {dimension_numbers = #tpu.dot_dimension_numbers<[1], [0], [0], [1], [0, 0, 1, 1], [], []>} : vector<8x200xbf16>, vector<200x16xbf16>, vector<8x16xf32> -> vector<8x16xf32>
    %cst_19 = arith.constant dense<0.000000e+00> : vector<8x16xf32>
    %49 = tpu.matmul %43, %44, %cst_19 {dimension_numbers = #tpu.dot_dimension_numbers<[1], [0], [0], [1], [0, 0, 1, 1], [], []>} : vector<8x200xbf16>, vector<200x16xbf16>, vector<8x16xf32> -> vector<8x16xf32>
    %50 = arith.addf %48, %49 : vector<8x16xf32>
    %cst_20 = arith.constant dense<0.000000e+00> : vector<8x16xf32>
    %51 = tpu.matmul %40, %47, %cst_20 {dimension_numbers = #tpu.dot_dimension_numbers<[1], [0], [0], [1], [0, 0, 1, 1], [], []>} : vector<8x200xbf16>, vector<200x16xbf16>, vector<8x16xf32> -> vector<8x16xf32>
    %52 = arith.addf %50, %51 : vector<8x16xf32>
    %c0_21 = arith.constant 0 : index
    %c0_22 = arith.constant 0 : index
    %53 = vector.load %arg7[%c0_21, %c0_22] : memref<1x16xf32, #tpu.memory_space<vmem>>, vector<1x16xf32>
    %54 = vector.broadcast %53 : vector<1x16xf32> to vector<8x16xf32>
    %55 = arith.addf %52, %54 : vector<8x16xf32>
    %c0_23 = arith.constant 0 : index
    %c0_24 = arith.constant 0 : index
    %56 = vector.load %arg8[%c0_23, %c0_24] : memref<8x16xf32, #tpu.memory_space<vmem>>, vector<8x16xf32>
    tpu.vector_store %arg8[%c0_23, %c0_24], %55 {strides = array<i32>} : memref<8x16xf32, #tpu.memory_space<vmem>>, vector<8x16xf32>,
    return
  }
  func.func @transform_0(%arg0: i32) -> (i32, i32) {
    %c0_i32 = arith.constant 0 : i32
    %c0_i32_0 = arith.constant 0 : i32
    return %arg0, %c0_i32 : i32, i32
  }
  func.func @transform_1(%arg0: i32) -> (i32, i32) {
    %c0_i32 = arith.constant 0 : i32
    %c0_i32_0 = arith.constant 0 : i32
    %c0_i32_1 = arith.constant 0 : i32
    return %c0_i32, %c0_i32_0 : i32, i32
  }
  func.func @transform_2(%arg0: i32) -> (i32, i32) {
    %c0_i32 = arith.constant 0 : i32
    %c0_i32_0 = arith.constant 0 : i32
    %c0_i32_1 = arith.constant 0 : i32
    return %c0_i32, %c0_i32_0 : i32, i32
  }
  func.func @transform_3(%arg0: i32) -> (i32, i32) {
    %c0_i32 = arith.constant 0 : i32
    %c0_i32_0 = arith.constant 0 : i32
    %c0_i32_1 = arith.constant 0 : i32
    return %c0_i32, %c0_i32_0 : i32, i32
  }
  func.func @transform_4(%arg0: i32) -> (i32, i32) {
    %c0_i32 = arith.constant 0 : i32
    %c0_i32_0 = arith.constant 0 : i32
    %c0_i32_1 = arith.constant 0 : i32
    return %c0_i32, %c0_i32_0 : i32, i32
  }
  func.func @transform_5(%arg0: i32) -> (i32, i32) {
    %c0_i32 = arith.constant 0 : i32
    %c0_i32_0 = arith.constant 0 : i32
    %c0_i32_1 = arith.constant 0 : i32
    return %c0_i32, %c0_i32_0 : i32, i32
  }
  func.func @transform_6(%arg0: i32) -> (i32, i32) {
    %c0_i32 = arith.constant 0 : i32
    %c0_i32_0 = arith.constant 0 : i32
    %c0_i32_1 = arith.constant 0 : i32
    return %c0_i32, %c0_i32_0 : i32, i32
  }
  func.func @transform_7(%arg0: i32) -> (i32, i32) {
    %c0_i32 = arith.constant 0 : i32
    %c0_i32_0 = arith.constant 0 : i32
    return %arg0, %c0_i32 : i32, i32
  }
}

</mosaic_0001>

<bundles_post_ra>
// kernel: tpu_custom_call.1
= control target key start
LH: loop header
LB: loop body
LE: loop exit
PB: predicated region body
PF: predicated region fallthrough
CT: control target
= control target key end

     0   :  { %v752_v3 = vmov 0.0   ;;  %vm753_vm0 = vmmov 0   ;;  %s1311_s0 = inlined_call_operand.vmem [shape: f32[8,32], index: 0, kind: input, shape index: {}]   ;;  %s1312_s1 = inlined_call_operand.vmem [shape: f32[32,50], index: 1, kind: input, shape index: {}]   ;;  %s1313_s2 = inlined_call_operand.vmem [shape: f32[1,50], index: 2, kind: input, shape index: {}]   ;;  %s1314_s3 = inlined_call_operand.vmem [shape: f32[50,200], index: 3, kind: input, shape index: {}]   ;;  %s1315_s4 = inlined_call_operand.vmem [shape: f32[1,200], index: 4, kind: input, shape index: {}]   ;;  %s1316_s5 = inlined_call_operand.vmem [shape: f32[200,16], index: 5, kind: input, shape index: {}]   ;;  %s1317_s6 = inlined_call_operand.vmem [shape: f32[1,16], index: 6, kind: input, shape index: {}]   ;;  %s1318_s7 = inlined_call_operand.hbm [shape: f32[8,16], index: 7, kind: output, shape index: {}]  }
   0x1   :  { %v29_v0 = vld [vmem:[%s1312_s1] sm:$0xff]  ;;  %v30_v1 = vld [vmem:[%s1312_s1 + $0x8] sm:$0xff]  ;;  %v31_v2 = vld [vmem:[%s1312_s1 + $0x10] sm:$0xff]  ;;  %700 = vmatprep.subr.bf16.mxu1 %v752_v3  ;;  %704 = vmatprep.mubr.msk.bf16.mxu1 %vm753_vm0, %v752_v3 }
   0x2   :  { %v37_v4 = vpack.c.bf16 %v30_v1, %v29_v0  ;;  %v32_v5 = vld [vmem:[%s1312_s1 + $0x18] sm:$0xff]  ;;  %v28_v6 = vld [vmem:[%s1311_s0] sm:$0xff] }
   0x3   :  { %12 = vsyncpa [#allocation3], 0  ;;  %v38_v7 = vpack.c.bf16 %v32_v5, %v31_v2  ;;  %v33_v8 = vpack.c.bf16 %v28_v6, %v28_v6  ;;  %716 = vmatprep.subr.bf16.mxu0 %v752_v3  ;;  %720 = vmatprep.mubr.msk.bf16.mxu0 %vm753_vm0, %v752_v3  ;;  %vm49_vm1 = vcmask 261120   ;;  %v187_v22 = vld [vmem:[%s1314_s3 + $0x8] sm:$0xff]  ;;  %v189_v23 = vld [vmem:[%s1314_s3 + $0x18] sm:$0xff]  ;;  %vm252_vm2 = vcmask 1040384  }
   0x4   :  { %701 = vmatpush3.bf16.msra.mxu1 %v37_v4  ;;  %v39_v9 = vunpack.c.l.bf16 %v37_v4  ;;  %v40_v10 = vunpack.c.h.bf16 %v37_v4  ;;  %v205_v24 = vpack.c.bf16 %v189_v23, %v187_v22  ;;  %v186_v25 = vld [vmem:[%s1314_s3] sm:$0xff]  ;;  %v188_v26 = vld [vmem:[%s1314_s3 + $0x10] sm:$0xff]  ;;  %v191_v28 = vld [vmem:[%s1314_s3 + $0x28] sm:$0xff]  ;;  %v754_v45 = vmov 0  }
   0x5   :  { %702 = vmatprep.subr.bf16.mxu1 %v752_v3  ;;  %v34_v11 = vunpack.c.l.bf16 %v33_v8  ;;  %v41_v12 = vunpack.c.l.bf16 %v38_v7  ;;  %v42_v13 = vunpack.c.h.bf16 %v38_v7  ;;  %v826_v27 = vpack.c.bf16 %v188_v26, %v186_v25  ;;  %v193_v29 = vld [vmem:[%s1314_s3 + $0x38] sm:$0xff]  ;;  %v190_v31 = vld [vmem:[%s1314_s3 + $0x20] sm:$0xff]  ;;  %v192_v32 = vld [vmem:[%s1314_s3 + $0x30] sm:$0xff] }
   0x6   :  { %v43_v14 = vsub.f32 %v29_v0, %v39_v9  ;;  %v44_v15 = vsub.f32 %v30_v1, %v40_v10  ;;  %v835_v30 = vpack.c.bf16 %v193_v29, %v191_v28  ;;  %v843_v33 = vpack.c.bf16 %v192_v32, %v190_v31  ;;  %v195_v34 = vld [vmem:[%s1314_s3 + $0x48] sm:$0xff]  ;;  %v197_v35 = vld [vmem:[%s1314_s3 + $0x58] sm:$0xff]  ;;  %v194_v37 = vld [vmem:[%s1314_s3 + $0x40] sm:$0xff] }
   0x7   :  { %v35_v16 = vsub.f32 %v28_v6, %v34_v11  ;;  %v45_v17 = vsub.f32 %v31_v2, %v41_v12  ;;  %v46_v18 = vsub.f32 %v32_v5, %v42_v13  ;;  %v853_v36 = vpack.c.bf16 %v197_v35, %v195_v34  ;;  %v196_v38 = vld [vmem:[%s1314_s3 + $0x50] sm:$0xff]  ;;  %v868_v40 = vld [vmem:[%s1314_s3 + $0x68] sm:$0x3]  ;;  %v198_v41 = vld [vmem:[%s1314_s3 + $0x60] sm:$0x3]  ;;  %s755_s3 = smov [#allocation2]  }
   0x8   :  { %703 = vmatpush3.bf16.msra.mxu1 %v38_v7  ;;  %v47_v19 = vpack.c.bf16 %v44_v15, %v43_v14  ;;  %v861_v39 = vpack.c.bf16 %v196_v38, %v194_v37  ;;  %v875_v42 = vpack.c.bf16 %v868_v40, %v868_v40  ;;  %v210_v43 = vpack.c.bf16 %v198_v41, %v198_v41  ;;  %v922_v14 = vld [vmem:[%s1316_s5] sm:$0xff]  ;;  %v927_v15 = vld [vmem:[%s1316_s5 + $0x8] sm:$0xff]  ;;  %s669_s12 = sshll.u32 %s755_s3, 4  ;;  %s670_s12 = int_to_ptr.vmem [resolvable:$true] %s669_s12 }
   0x9   :  { %v36_v20 = vpack.c.bf16 %v35_v16, %v35_v16  ;;  %708 = vmatprep.subr.bf16.mxu1 %v752_v3  ;;  %v48_v21 = vpack.c.bf16 %v46_v18, %v45_v17  ;;  %v213_v46 = vunpack.c.l.bf16 %v205_v24  ;;  %v215_v47 = vunpack.c.h.bf16 %v205_v24  ;;  %v936_v17 = vld [vmem:[%s1316_s5 + $0x10] sm:$0xff]  ;;  %v941_v18 = vld [vmem:[%s1316_s5 + $0x18] sm:$0xff]  ;;  %s728_s13 = scalar_lea.vmem %s670_s12, 128  ;;  %p733_p1 = scmp.lt.s32.totalorder %s670_s12, %s670_s12 }
   0xa   :  { %717 = vmatpush3.bf16.msra.mxu0 %v47_v19  ;;  %v880_v44 = vsel %vm252_vm2, %v210_v43, 0  ;;  %v212_v48 = vunpack.c.l.bf16 %v826_v27  ;;  %v214_v49 = vunpack.c.h.bf16 %v826_v27  ;;  %v217_v55 = vunpack.c.l.bf16 %v835_v30  ;;  %p729_p0 = scmp.ne.s32.totalorder %s670_s12, %s728_s13  ;;  %p734_p2 = scmp.lt.s32.totalorder %s728_s13, %s728_s13 }
   0xb   :  { %705 = vmatmul.mubr.msk.bf16.vlgmr.msra.gmra.mrb[0].mxu1 %vm49_vm1, %v36_v20  ;;  %718 = vmatprep.subr.bf16.mxu0 %v752_v3  ;;  %v887_v50 = vsub.f32 %v187_v22, %v213_v46  ;;  %v889_v51 = vsub.f32 %v189_v23, %v215_v47  ;;  %v219_v56 = vunpack.c.h.bf16 %v835_v30  ;;  %v216_v58 = vunpack.c.l.bf16 %v843_v33  ;;  %v952_v20 = vld [vmem:[%s1316_s5 + $0x20] sm:$0xff] }
   0xc   :  { %709 = vmatpush3.bf16.msra.mxu1 %v37_v4  ;;  %712 = vmatprep.mubr.msk.bf16.mxu1 %vm753_vm0, %v752_v3  ;;  %v891_v52 = vsub.f32 %v186_v25, %v212_v48  ;;  %v893_v53 = vsub.f32 %v188_v26, %v214_v49  ;;  %v218_v59 = vunpack.c.h.bf16 %v843_v33  ;;  %v903_v60 = vsub.f32 %v191_v28, %v217_v55  ;;  %p735_p3 = por %p734_p2, %p733_p1 }
   0xd   :  { %710 = vmatprep.subr.bf16.mxu1 %v752_v3  ;;  %v241_v54 = vpack.c.bf16 %v889_v51, %v887_v50  ;;  %v905_v61 = vsub.f32 %v193_v29, %v219_v56  ;;  %v907_v62 = vsub.f32 %v190_v31, %v216_v58  ;;  %v221_v1 = vunpack.c.l.bf16 %v853_v36  ;;  %v1023_v50 = vld [vmem:[%s1316_s5 + $0x40] sm:$0xff]  ;;  %v1028_v51 = vld [vmem:[%s1316_s5 + $0x48] sm:$0xff] }
   0xe   :  { %719 = vmatpush3.bf16.msra.mxu0 %v48_v21  ;;  %v240_v57 = vpack.c.bf16 %v893_v53, %v891_v52  ;;  %v909_v63 = vsub.f32 %v192_v32, %v218_v59  ;;  %v223_v2 = vunpack.c.h.bf16 %v853_v36  ;;  %v220_v4 = vunpack.c.l.bf16 %v861_v39  ;;  %v957_v21 = vld [vmem:[%s1316_s5 + $0x28] sm:$0xff]  ;;  %v1041_v53 = vld [vmem:[%s1316_s5 + $0x50] sm:$0xff]  ;;  %v1062_v59 = vld [vmem:[%s1316_s5 + $0x60] sm:$0xff]  ;;  %p736_p4 = pnand %p735_p3, %p729_p0 }
   0xf   :  { %526 = vmatprep.subr.bf16.mxu0 %v754_v45  ;;  %v243_v0 = vpack.c.bf16 %v905_v61, %v903_v60  ;;  %v222_v5 = vunpack.c.h.bf16 %v861_v39  ;;  %v224_v6 = vunpack.c.l.bf16 %v210_v43  ;;  %v931_v16 = vpack.c.bf16 %v927_v15, %v922_v14  ;;  %v1067_v60 = vld [vmem:[%s1316_s5 + $0x68] sm:$0xff] }
  0x10   :  { %711 = vmatpush3.bf16.msra.mxu1 %v38_v7  ;;  %v242_v3 = vpack.c.bf16 %v909_v63, %v907_v62  ;;  %v235_v7 = vsub.f32 %v195_v34, %v221_v1  ;;  %v234_v9 = vsub.f32 %v194_v37, %v220_v4  ;;  %v947_v19 = vpack.c.bf16 %v941_v18, %v936_v17  ;;  %v1080_v62 = vld [vmem:[%s1316_s5 + $0x70] sm:$0xff]  ;;  %v1085_v63 = vld [vmem:[%s1316_s5 + $0x78] sm:$0xff]  ;;  %v1095_v1 = vld [vmem:[%s1316_s5 + $0x80] sm:$0xff] }
  0x11   :  { %721 = vmatmul.mubr.msk.bf16.vlgmr.msra.gmra.mrb[0].mxu0 %vm49_vm1, %v33_v8  ;;  %259 = vmatprep.subr.bf16.mxu1 %v205_v24  ;;  %v236_v10 = vsub.f32 %v196_v38, %v222_v5  ;;  %v238_v13 = vsub.f32 %v198_v41, %v224_v6  ;;  %v963_v22 = vpack.c.bf16 %v957_v21, %v952_v20  ;;  %v680_v38 = vld [vmem:[%s1313_s2] ss:$0 sm:$0xff]  ;;  %vm248_vm3 = vcmask 408576   ;;  %v1113_v4 = vld [vmem:[%s1316_s5 + $0x90] sm:$0xff]  ;;  %v1118_v5 = vld [vmem:[%s1316_s5 + $0x98] sm:$0xff] }
  0x12   :  { %527 = vmatpush1.bf16.msra.mxu0 %v931_v16  ;;  %v1033_v52 = vpack.c.bf16 %v1028_v51, %v1023_v50  ;;  %v1072_v61 = vpack.c.bf16 %v1067_v60, %v1062_v59  ;;  %v1123_v6 = vpack.c.bf16 %v1118_v5, %v1113_v4  ;;  %vm522_vm4 = vcmask 1043456  }
  0x13   :  { %713 = vmatmul.mubr.msk.bf16.vlgmr.msra.gmra.mrb[4].mxu1 %vm49_vm1, %v33_v8  ;;  %v237_v8 = vsub.f32 %v197_v35, %v223_v2  ;;  %v244_v12 = vpack.c.bf16 %v236_v10, %v234_v9  ;;  %528 = vmatprep.subr.bf16.mxu0 %v754_v45  ;;  %v1100_v2 = vld [vmem:[%s1316_s5 + $0x88] sm:$0xff]  ;;  %v431_v10 = vld [vmem:[%s1316_s5 + $0xb0] sm:$0xff]  ;;  %vm518_vm5 = vcmask 588800   ;;  %vm661_vm6 = vcmask 130048  }
  0x14   :  { %260 = vmatpush1.bf16.msra.mxu1 %v826_v27  ;;  %291 = vmatprep.mubr.bf16.mxu1 %v754_v45 }
  0x15   :  { %261 = vmatprep.subr.bf16.mxu1 %v835_v30  ;;  %v245_v11 = vpack.c.bf16 %v237_v8, %v235_v7  ;;  %v429_v7 = vld [vmem:[%s1316_s5 + $0xa0] sm:$0xff]  ;;  %v430_v8 = vld [vmem:[%s1316_s5 + $0xa8] sm:$0xff] }
  0x16   :  { %529 = vmatpush1.bf16.msra.mxu0 %v947_v19  ;;  %v452_v9 = vpack.c.bf16 %v430_v8, %v429_v7 }
  0x17   :  { %530 = vmatprep.subr.bf16.mxu0 %v754_v45 }
  0x18   :  { %262 = vmatpush1.bf16.msra.mxu1 %v843_v33 }
  0x19   :  { %263 = vmatprep.subr.bf16.mxu1 %v853_v36 }
  0x1a   :  { %531 = vmatpush1.bf16.msra.mxu0 %v963_v22 }
  0x1b   :  { %532 = vmatprep.subr.bf16.mxu0 %v754_v45 }
  0x1c   :  { %264 = vmatpush1.bf16.msra.mxu1 %v861_v39 }
  0x1d   :  { %681 = vmatprep.subr.msk.bf16.mxu1 %vm252_vm2, %v875_v42 }
  0x20   :  { %266 = vmatpush1.bf16.msra.mxu1 %v880_v44 }
  0x21   :  { %303 = vmatprep.subr.bf16.mxu1 %v205_v24 }
  0xde   :  { %v87_v23 = vpop.f32.mrb[0].mxu1 }
  0xdf   :  { %v706_v24 = vpop.f32.mrb[1].mxu1 }
  0xe0   :  { %v90_v25 = vpop.f32.mrb[2].mxu1 }
  0xe1   :  { %v707_v26 = vpop.f32.mrb[3].mxu1 }
  0xe4   :  { %v170_v28 = vpop.f32.mrb[0].mxu0 }
  0xe5   :  { %v722_v29 = vpop.f32.mrb[1].mxu0 }
  0xe6   :  { %v130_v31 = vpop.f32.mrb[4].mxu1  ;;  %v173_v32 = vpop.f32.mrb[2].mxu0 }
  0xe7   :  { %v131_v34 = vadd.f32 %v130_v31, %v87_v23  ;;  %v714_v35 = vpop.f32.mrb[5].mxu1  ;;  %v723_v37 = vpop.f32.mrb[3].mxu0  ;;  %v463_v32 = vunpack.c.l.bf16 %v1033_v52 }
  0xe8   :  { %v133_v41 = vpop.f32.mrb[6].mxu1 }
  0xe9   :  { %v176_v43 = vadd.f32 %v170_v28, %v131_v34  ;;  %v715_v46 = vpop.f32.mrb[7].mxu1  ;;  %v464_v34 = vunpack.c.h.bf16 %v1033_v52  ;;  %v1166_v35 = vsub.f32 %v1023_v50, %v463_v32 }
  0xeb   :  { %v184_v47 = vadd.f32 %v680_v38, %v176_v43  ;;  %v1169_v37 = vsub.f32 %v1028_v51, %v464_v34 }
  0xed   :  { %v185_v48 = vmax.f32 %v184_v47, 0.0  ;;  %v509_v38 = vpack.c.bf16 %v1169_v37, %v1166_v35 }
  0xef   :  { %v200_v49 = vpack.c.bf16 %v185_v48, %v185_v48 }
  0xf1   :  { %v201_v55 = vunpack.c.l.bf16 %v200_v49 }
  0xf3   :  { %v202_v56 = vsub.f32 %v185_v48, %v201_v55  ;;  %v468_v55 = vunpack.c.h.bf16 %v1072_v61 }
  0xf5   :  { %v203_v58 = vpack.c.bf16 %v202_v56, %v202_v56 }
  0xf7   :  { %682 = vmatmul.mubr.msk.bf16.vlgmr.msra.gmra.mrb[8].mxu1 %vm248_vm3, %v203_v58  ;;  %v1189_v58 = vsub.f32 %v1067_v60, %v468_v55 }
  0xf8   :  { %304 = vmatpush1.bf16.msra.mxu1 %v826_v27  ;;  %335 = vmatprep.mubr.bf16.mxu1 %v754_v45  ;;  %v225_v27 = vunpack.c.l.bf16 %v875_v42 }
  0xf9   :  { %305 = vmatprep.subr.bf16.mxu1 %v835_v30 }
  0xfa   :  { %v239_v30 = vsub.f32 %v868_v40, %v225_v27  ;;  %v1009_v40 = vld [vmem:[%s1316_s5 + $0x30] sm:$0xff] }
  0xfc   :  { %306 = vmatpush1.bf16.msra.mxu1 %v843_v33  ;;  %v247_v33 = vpack.c.bf16 %v239_v30, %v239_v30 }
  0xfd   :  { %307 = vmatprep.subr.bf16.mxu1 %v853_v36  ;;  %v246_v36 = vpack.c.bf16 %v238_v13, %v238_v13  ;;  %v433_v13 = vld [vmem:[%s1316_s5 + $0xc0] sm:$0xff] }
  0xfe   :  { %v454_v23 = vpack.c.bf16 %v433_v13, %v433_v13 }
 0x100   :  { %308 = vmatpush1.bf16.msra.mxu1 %v861_v39  ;;  %v345_v39 = vsel %vm252_vm2, %v246_v36, 0  ;;  %v524_v24 = vsel %vm522_vm4, %v454_v23, 0 }
 0x101   :  { %683 = vmatprep.subr.msk.bf16.mxu1 %vm252_vm2, %v875_v42  ;;  %v1014_v42 = vld [vmem:[%s1316_s5 + $0x38] sm:$0xff] }
 0x104   :  { %310 = vmatpush1.bf16.msra.mxu1 %v880_v44  ;;  %v1018_v44 = vpack.c.bf16 %v1014_v42, %v1009_v40 }
 0x105   :  { %350 = vmatprep.subr.bf16.mxu1 %v241_v54  ;;  %v1046_v54 = vld [vmem:[%s1316_s5 + $0x58] sm:$0xff] }
 0x106   :  { %533 = vmatpush1.bf16.msra.mxu0 %v1018_v44  ;;  %v461_v25 = vunpack.c.l.bf16 %v1018_v44  ;;  %v462_v26 = vunpack.c.h.bf16 %v1018_v44 }
 0x107   :  { %684 = vmatmul.mubr.msk.bf16.vlgmr.msra.gmra.mrb[12].mxu1 %vm248_vm3, %v200_v49  ;;  %534 = vmatprep.subr.bf16.mxu0 %v754_v45 }
 0x108   :  { %351 = vmatpush1.bf16.msra.mxu1 %v240_v57  ;;  %382 = vmatprep.mubr.bf16.mxu1 %v754_v45  ;;  %v1051_v57 = vpack.c.bf16 %v1046_v54, %v1041_v53  ;;  %v1156_v28 = vsub.f32 %v1009_v40, %v461_v25  ;;  %v1159_v29 = vsub.f32 %v1014_v42, %v462_v26 }
 0x109   :  { %352 = vmatprep.subr.bf16.mxu1 %v243_v0  ;;  %v1090_v0 = vpack.c.bf16 %v1085_v63, %v1080_v62 }
 0x10a   :  { %535 = vmatpush1.bf16.msra.mxu0 %v1033_v52  ;;  %v508_v31 = vpack.c.bf16 %v1159_v29, %v1156_v28  ;;  %v465_v41 = vunpack.c.l.bf16 %v1051_v57  ;;  %v466_v43 = vunpack.c.h.bf16 %v1051_v57 }
 0x10b   :  { %536 = vmatprep.subr.bf16.mxu0 %v754_v45  ;;  %v469_v30 = vunpack.c.l.bf16 %v1090_v0 }
 0x10c   :  { %353 = vmatpush1.bf16.msra.mxu1 %v242_v3  ;;  %v1105_v3 = vpack.c.bf16 %v1100_v2, %v1095_v1  ;;  %v1176_v46 = vsub.f32 %v1041_v53, %v465_v41  ;;  %v1179_v47 = vsub.f32 %v1046_v54, %v466_v43  ;;  %v473_v53 = vunpack.c.l.bf16 %v1123_v6 }
 0x10d   :  { %354 = vmatprep.subr.bf16.mxu1 %v245_v11  ;;  %v432_v11 = vld [vmem:[%s1316_s5 + $0xb8] sm:$0xff]  ;;  %v1196_v36 = vsub.f32 %v1080_v62, %v469_v30  ;;  %v474_v54 = vunpack.c.h.bf16 %v1123_v6  ;;  %v476_v62 = vunpack.c.h.bf16 %v452_v9 }
 0x10e   :  { %537 = vmatpush1.bf16.msra.mxu0 %v1051_v57  ;;  %v510_v48 = vpack.c.bf16 %v1179_v47, %v1176_v46  ;;  %v471_v42 = vunpack.c.l.bf16 %v1105_v3  ;;  %v690_v46 = vld [vmem:[%s1317_s6] ss:$0 sm:$0xff] }
 0x10f   :  { %538 = vmatprep.subr.bf16.mxu0 %v754_v45 }
 0x110   :  { %355 = vmatpush1.bf16.msra.mxu1 %v244_v12  ;;  %v453_v12 = vpack.c.bf16 %v432_v11, %v431_v10  ;;  %v1206_v50 = vsub.f32 %v1095_v1, %v471_v42 }
 0x111   :  { %685 = vmatprep.subr.msk.bf16.mxu1 %vm252_vm2, %v247_v33  ;;  %v470_v33 = vunpack.c.h.bf16 %v1090_v0 }
 0x112   :  { %539 = vmatpush1.bf16.msra.mxu0 %v1072_v61 }
 0x113   :  { %540 = vmatprep.subr.bf16.mxu0 %v754_v45 }
 0x114   :  { %357 = vmatpush1.bf16.msra.mxu1 %v345_v39  ;;  %v1199_v39 = vsub.f32 %v1085_v63, %v470_v33 }
 0x115   :  { %569 = vmatprep.subr.bf16.mxu1 %v754_v45 }
 0x116   :  { %541 = vmatpush1.bf16.msra.mxu0 %v1090_v0  ;;  %v512_v40 = vpack.c.bf16 %v1199_v39, %v1196_v36 }
 0x117   :  { %686 = vmatmul.mubr.msk.bf16.vlgmr.msra.gmra.mrb[16].mxu1 %vm248_vm3, %v200_v49  ;;  %542 = vmatprep.subr.bf16.mxu0 %v754_v45  ;;  %v467_v49 = vunpack.c.l.bf16 %v1072_v61 }
 0x118   :  { %570 = vmatpush1.bf16.msra.mxu1 %v931_v16 }
 0x119   :  { %571 = vmatprep.subr.bf16.mxu1 %v754_v45  ;;  %v1186_v56 = vsub.f32 %v1062_v59, %v467_v49  ;;  %v1219_v59 = vsub.f32 %v1118_v5, %v474_v54 }
 0x11a   :  { %543 = vmatpush1.bf16.msra.mxu0 %v1105_v3 }
 0x11b   :  { %544 = vmatprep.subr.bf16.mxu0 %v754_v45  ;;  %v511_v27 = vpack.c.bf16 %v1189_v58, %v1186_v56 }
 0x11c   :  { %572 = vmatpush1.bf16.msra.mxu1 %v947_v19 }
 0x11d   :  { %573 = vmatprep.subr.bf16.mxu1 %v754_v45 }
 0x11e   :  { %545 = vmatpush1.bf16.msra.mxu0 %v1123_v6 }
 0x11f   :  { %546 = vmatprep.subr.bf16.mxu0 %v754_v45 }
 0x120   :  { %574 = vmatpush1.bf16.msra.mxu1 %v963_v22 }
 0x121   :  { %575 = vmatprep.subr.bf16.mxu1 %v754_v45 }
 0x122   :  { %547 = vmatpush1.bf16.msra.mxu0 %v452_v9 }
 0x123   :  { %548 = vmatprep.subr.bf16.mxu0 %v754_v45 }
 0x124   :  { %576 = vmatpush1.bf16.msra.mxu1 %v1018_v44  ;;  %v472_v44 = vunpack.c.h.bf16 %v1105_v3 }
 0x125   :  { %577 = vmatprep.subr.bf16.mxu1 %v754_v45 }
 0x126   :  { %549 = vmatpush1.bf16.msra.mxu0 %v453_v12  ;;  %v1209_v51 = vsub.f32 %v1100_v2, %v472_v44  ;;  %v477_v2 = vunpack.c.l.bf16 %v453_v12 }
 0x127   :  { %550 = vmatprep.subr.bf16.mxu0 %v754_v45 }
 0x128   :  { %578 = vmatpush1.bf16.msra.mxu1 %v1033_v52  ;;  %v513_v52 = vpack.c.bf16 %v1209_v51, %v1206_v50 }
 0x129   :  { %579 = vmatprep.subr.bf16.mxu1 %v754_v45 }
 0x12a   :  { %551 = vmatpush1.bf16.msra.mxu0 %v524_v24 }
 0x12b   :  { %612 = vmatprep.subr.bf16.mxu0 %v754_v45 }
 0x12c   :  { %580 = vmatpush1.bf16.msra.mxu1 %v1051_v57  ;;  %v1216_v57 = vsub.f32 %v1113_v4, %v473_v53  ;;  %v1229_v4 = vsub.f32 %v431_v10, %v477_v2 }
 0x12d   :  { %581 = vmatprep.subr.bf16.mxu1 %v754_v45 }
 0x12e   :  { %v514_v60 = vpack.c.bf16 %v1219_v59, %v1216_v57 }
 0x130   :  { %582 = vmatpush1.bf16.msra.mxu1 %v1072_v61  ;;  %v475_v61 = vunpack.c.l.bf16 %v452_v9 }
 0x131   :  { %583 = vmatprep.subr.bf16.mxu1 %v754_v45 }
 0x132   :  { %v1223_v63 = vsub.f32 %v429_v7, %v475_v61 }
 0x134   :  { %584 = vmatpush1.bf16.msra.mxu1 %v1090_v0  ;;  %v1225_v0 = vsub.f32 %v430_v8, %v476_v62 }
 0x135   :  { %585 = vmatprep.subr.bf16.mxu1 %v754_v45 }
 0x136   :  { %v515_v1 = vpack.c.bf16 %v1225_v0, %v1223_v63 }
 0x138   :  { %586 = vmatpush1.bf16.msra.mxu1 %v1105_v3  ;;  %v478_v3 = vunpack.c.h.bf16 %v453_v12 }
 0x139   :  { %587 = vmatprep.subr.bf16.mxu1 %v754_v45 }
 0x13c   :  { %588 = vmatpush1.bf16.msra.mxu1 %v1123_v6  ;;  %v479_v6 = vunpack.c.l.bf16 %v454_v23 }
 0x13d   :  { %589 = vmatprep.subr.bf16.mxu1 %v754_v45 }
 0x13e   :  { %v504_v25 = vsub.f32 %v433_v13, %v479_v6  ;;  %v393_v13 = vld [vmem:[%s1315_s4] sm:$0x3] }
 0x140   :  { %590 = vmatpush1.bf16.msra.mxu1 %v452_v9  ;;  %v517_v26 = vpack.c.bf16 %v504_v25, %v504_v25 }
 0x141   :  { %591 = vmatprep.subr.bf16.mxu1 %v754_v45 }
 0x142   :  { %v1236_v7 = vsel %vm522_vm4, %v517_v26, 0 }
 0x144   :  { %592 = vmatpush1.bf16.msra.mxu1 %v453_v12 }
 0x145   :  { %593 = vmatprep.subr.bf16.mxu1 %v754_v45 }
 0x148   :  { %594 = vmatpush1.bf16.msra.mxu1 %v524_v24  ;;  %v1231_v24 = vsub.f32 %v432_v11, %v478_v3  ;;  %v395_v11 = vlaneseq }
 0x14a   :  { %v516_v5 = vpack.c.bf16 %v1231_v24, %v1229_v4  ;;  %v396_v55 = vshrl.u32 %v395_v11, 7  ;;  %v458_v11 = vunpack.c.h.bf16 %v947_v19 }
 0x14c   :  { %v397_v30 = vsub.s32 0, %v396_v55  ;;  %v401_v33 = vsub.s32 1, %v396_v55 }
 0x14e   :  { %v398_v42 = vrot.slane %v393_v13, %v397_v30  ;;  %v402_v53 = vrot.slane %v393_v13, %v401_v33 }
 0x1ca   :  { %v293_v8 = vpop.f32.mrb[8].mxu1 }
 0x1cb   :  { %v295_v9 = vpop.f32.mrb[9].mxu1 }
 0x1cc   :  { %v297_v32 = vpop.f32.mrb[10].mxu1 }
 0x1cd   :  { %v298_v34 = vpop.f32.mrb[11].mxu1 }
 0x1da   :  { %v337_v41 = vpop.f32.mrb[12].mxu1 }
 0x1db   :  { %v338_v43 = vadd.f32 %v337_v41, %v293_v8  ;;  %v339_v12 = vpop.f32.mrb[13].mxu1  ;;  %v455_v8 = vunpack.c.l.bf16 %v931_v16 }
 0x1dc   :  { %v340_v23 = vadd.f32 %v339_v12, %v295_v9  ;;  %v341_v10 = vpop.f32.mrb[14].mxu1  ;;  %v456_v9 = vunpack.c.h.bf16 %v931_v16 }
 0x1dd   :  { %v342_v49 = vpop.f32.mrb[15].mxu1  ;;  %v480_v10 = vsub.f32 %v922_v14, %v455_v8  ;;  %v459_v14 = vunpack.c.l.bf16 %v963_v22 }
 0x1ea   :  { %v384_v44 = vpop.f32.mrb[16].mxu1 }
 0x1eb   :  { %v391_v54 = vadd.f32 %v384_v44, %v338_v43  ;;  %v386_v61 = vpop.f32.mrb[17].mxu1  ;;  %v481_v43 = vsub.f32 %v927_v15, %v456_v9  ;;  %v460_v15 = vunpack.c.h.bf16 %v963_v22 }
 0x1ec   :  { %v392_v62 = vadd.f32 %v386_v61, %v340_v23  ;;  %v388_v2 = vpop.f32.mrb[18].mxu1  ;;  %v457_v23 = vunpack.c.l.bf16 %v947_v19 }
 0x1ed   :  { %v405_v3 = vadd.f32 %v398_v42, %v391_v54  ;;  %v389_v6 = vpop.f32.mrb[19].mxu1  ;;  %v505_v16 = vpack.c.bf16 %v481_v43, %v480_v10  ;;  %v483_v42 = vsub.f32 %v941_v18, %v458_v11  ;;  %v485_v54 = vsub.f32 %v957_v21, %v460_v15 }
 0x1ee   :  { %v406_v25 = vadd.f32 %v402_v53, %v392_v62  ;;  %v482_v13 = vsub.f32 %v936_v17, %v457_v23  ;;  %v484_v53 = vsub.f32 %v952_v20, %v459_v14 }
 0x1ef   :  { %v407_v26 = vmax.f32 %v405_v3, 0.0 }
 0x1f0   :  { %v408_v32 = vmax.f32 %v406_v25, 0.0  ;;  %v506_v19 = vpack.c.bf16 %v483_v42, %v482_v13  ;;  %v507_v17 = vpack.c.bf16 %v485_v54, %v484_v53 }
 0x1f1   :  { %v434_v34 = vpack.c.bf16 %v407_v26, %v407_v26 }
 0x1f2   :  { %v435_v41 = vpack.c.bf16 %v408_v32, %v408_v32 }
 0x1f3   :  { %v436_v12 = vunpack.c.l.bf16 %v434_v34 }
 0x1f4   :  { %v437_v49 = vunpack.c.l.bf16 %v435_v41  ;;  %688 = vmatprep.mubr.msk.bf16.mxu1 %vm518_vm5, %v435_v41 }
 0x1f5   :  { %v438_v55 = vsub.f32 %v407_v26, %v436_v12  ;;  %602 = vmatmul.mubr.bf16.vlgmr.msra.gmra.mrb[20].mxu1 %v434_v34 }
 0x1f6   :  { %v439_v30 = vsub.f32 %v408_v32, %v437_v49 }
 0x1f7   :  { %v440_v44 = vpack.c.bf16 %v438_v55, %v438_v55 }
 0x1f8   :  { %v441_v33 = vpack.c.bf16 %v439_v30, %v439_v30 }
 0x1fa   :  { %687 = vmatprep.mubr.msk.bf16.mxu0 %vm518_vm5, %v441_v33 }
 0x1fb   :  { %559 = vmatmul.mubr.bf16.vlgmr.msra.gmra.mrb[4].mxu0 %v440_v44 }
 0x1fc   :  { %613 = vmatpush1.bf16.msra.mxu0 %v505_v16  ;;  %689 = vmatprep.mubr.msk.bf16.mxu0 %vm518_vm5, %v435_v41 }
 0x1fd   :  { %614 = vmatprep.subr.bf16.mxu0 %v754_v45 }
 0x200   :  { %615 = vmatpush1.bf16.msra.mxu0 %v506_v19 }
 0x201   :  { %616 = vmatprep.subr.bf16.mxu0 %v754_v45 }
 0x204   :  { %617 = vmatpush1.bf16.msra.mxu0 %v507_v17 }
 0x205   :  { %618 = vmatprep.subr.bf16.mxu0 %v754_v45 }
 0x208   :  { %619 = vmatpush1.bf16.msra.mxu0 %v508_v31 }
 0x209   :  { %620 = vmatprep.subr.bf16.mxu0 %v754_v45 }
 0x20c   :  { %621 = vmatpush1.bf16.msra.mxu0 %v509_v38 }
 0x20d   :  { %622 = vmatprep.subr.bf16.mxu0 %v754_v45 }
 0x210   :  { %623 = vmatpush1.bf16.msra.mxu0 %v510_v48 }
 0x211   :  { %624 = vmatprep.subr.bf16.mxu0 %v754_v45 }
 0x214   :  { %625 = vmatpush1.bf16.msra.mxu0 %v511_v27 }
 0x215   :  { %626 = vmatprep.subr.bf16.mxu0 %v754_v45 }
 0x218   :  { %627 = vmatpush1.bf16.msra.mxu0 %v512_v40 }
 0x219   :  { %628 = vmatprep.subr.bf16.mxu0 %v754_v45 }
 0x21c   :  { %629 = vmatpush1.bf16.msra.mxu0 %v513_v52 }
 0x21d   :  { %630 = vmatprep.subr.bf16.mxu0 %v754_v45 }
 0x220   :  { %631 = vmatpush1.bf16.msra.mxu0 %v514_v60 }
 0x221   :  { %632 = vmatprep.subr.bf16.mxu0 %v754_v45 }
 0x224   :  { %633 = vmatpush1.bf16.msra.mxu0 %v515_v1 }
 0x225   :  { %634 = vmatprep.subr.bf16.mxu0 %v754_v45 }
 0x228   :  { %635 = vmatpush1.bf16.msra.mxu0 %v516_v5 }
 0x229   :  { %636 = vmatprep.subr.bf16.mxu0 %v754_v45 }
 0x22c   :  { %637 = vmatpush1.bf16.msra.mxu0 %v1236_v7 }
 0x22f   :  { %645 = vmatmul.mubr.bf16.vlgmr.msra.gmra.mrb[8].mxu0 %v434_v34 }
 0x2c8   :  { %v603_v18 = vpop.f32.mrb[20].mxu1 }
 0x2c9   :  { %v605_v20 = vpop.f32.mrb[21].mxu1 }
 0x2ca   :  { %v606_v21 = vpop.f32.mrb[22].mxu1 }
 0x2cb   :  { %v607_v22 = vpop.f32.mrb[23].mxu1 }
 0x2ce   :  { %v560_v28 = vpop.f32.mrb[4].mxu0 }
 0x2cf   :  { %v604_v29 = vadd.f32 %v603_v18, %v560_v28  ;;  %v562_v31 = vpop.f32.mrb[5].mxu0 }
 0x2d0   :  { %v563_v35 = vpop.f32.mrb[6].mxu0 }
 0x2d1   :  { %v564_v37 = vpop.f32.mrb[7].mxu0 }
 0x302   :  { %v646_v38 = vpop.f32.mrb[8].mxu0 }
 0x303   :  { %v652_v45 = vadd.f32 %v646_v38, %v604_v29  ;;  %v648_v47 = vpop.f32.mrb[9].mxu0 }
 0x304   :  { %v649_v48 = vpop.f32.mrb[10].mxu0 }
 0x305   :  { %v660_v56 = vadd.f32 %v690_v46, %v652_v45  ;;  %v650_v58 = vpop.f32.mrb[11].mxu0 }
 0x307   :  { %662 = vst.msk [vmem:[#allocation2] sm:$0xff] %vm661_vm6, %v660_v56 }
 0x308   :  { %739 = shalt.err (!%p736_p4)
}
 0x309   :  { %s740_s6 = scalar_lea.hbm %s1318_s7, 128 }
 0x30a   :  { %p741_p5 = scmp.ne.s32.totalorder %s1318_s7, %s740_s6  ;;  %p744_p6 = scmp.lt.u32.totalorder %s740_s6, %s1318_s7 }
 0x30c   :  { %p746_p7 = pnand %p744_p6, %p741_p5 }
 0x30e   :  { %749 = shalt.err (!%p746_p7)
}
 0x30f   :  { %672 = dma.vmem_to_hbm [thread:$0]  %s670_s12, 128, %s1318_s7, [#allocation3]  }
 0x310   :  { %750 = dma.done.wait [#allocation3], 128  }
 0x311   :  { %751 = vsyncadd [#allocation3], 4294967168 }
 0x312   :  { %676 = vsyncpa [#allocation3], 1 }

</bundles_post_ra>
